<compile_context>
chip_gen: v7x
topology: tpu7x:2x2x1
jax: 0.10.0
libtpu: 0.0.40
codegen_flags: <defaults>
</compile_context>

<pallas_src>
import jax
import jax.numpy as jnp
from jax.experimental import pallas as pl
from jax.experimental.pallas import tpu as pltpu


def _round_up(n, m):
    return ((n + m - 1) // m) * m


def _sublane_multiple(dtype):
    itemsize = jnp.dtype(dtype).itemsize
    return {1: 32, 2: 16, 4: 8}.get(itemsize, 8)


def _vmem_capacity_bytes():
    try:
        return int(pltpu.get_tpu_info().vmem_capacity_bytes)
    except Exception:
        return 64 * 1024 * 1024  # conservative: v7x physical VMEM


def prepare_prototypes_weight(w):
    """One-time conversion of the PyTorch-layout weight [P, D] -> kernel-native [D, P].

    Hoist this out of the per-step path (call once whenever the prototype
    weights are created/updated)."""
    return jnp.asarray(w).T


def _prototypes_kernel(x_ref, wt_ref, o_ref):
    # x_ref: (tm, D), wt_ref: (D, tn) pre-transposed weight, o_ref: (tm, tn)
    o_ref[...] = jnp.dot(
        x_ref[...], wt_ref[...], preferred_element_type=jnp.float32
    ).astype(o_ref.dtype)


def prototypes_forward_t(x, w_t, *, tm=4096, tn_max=2048):
    """Linear w/o bias with pre-transposed weight: x:[B, D], w_t:[D, P] -> [B, P]."""
    B, D = x.shape
    D2, P = w_t.shape
    assert D == D2, "feature dims of x and weight must match"

    itemsize = jnp.dtype(x.dtype).itemsize
    sub = _sublane_multiple(x.dtype)

    # ---- prototype (lane) tile: full dim if it fits, else 128-multiples ----
    if P <= tn_max:
        tn = P                              # full last dim -> always legal
    else:
        tn = (tn_max // 128) * 128          # multiple of 128; ragged tail masked

    # ---- batch (sublane) tile ----
    tm = max(sub, _round_up(min(tm, B), sub))

    # Spread work over both TensorCores (v7x megacore) when B is big enough.
    if B >= 2 * sub and pl.cdiv(B, tm) < 2:
        tm = max(sub, _round_up(pl.cdiv(B, 2), sub))

    # ---- VMEM budget (generation-aware; double-buffered x/w/out tiles) ----
    cap = _vmem_capacity_bytes()
    budget = int(cap * 0.6)

    def vmem_bytes(tm_, tn_):
        return (2 * tm_ * D + 2 * D * tn_ + 2 * tm_ * tn_) * itemsize

    while tm > sub and vmem_bytes(tm, tn) > budget:
        tm = max(sub, (tm // 2) // sub * sub)
    while tn > 128 and vmem_bytes(tm, tn) > budget:
        tn = max(128, (tn // 2) // 128 * 128)

    need = vmem_bytes(tm, tn)
    # Never clamp the limit below the actual requirement; stay under physical.
    vmem_limit = int(min(max(need + (2 << 20), 32 * 1024 * 1024), int(cap * 0.9)))

    grid = (pl.cdiv(B, tm), pl.cdiv(P, tn))

    return pl.pallas_call(
        _prototypes_kernel,
        out_shape=jax.ShapeDtypeStruct((B, P), x.dtype),
        grid=grid,
        in_specs=[
            # x block index is constant in j -> not re-DMA'd across prototype tiles.
            pl.BlockSpec((tm, D), lambda i, j: (i, 0)),
            # weight block index constant in i -> stays resident across batch tiles.
            pl.BlockSpec((D, tn), lambda i, j: (0, j)),
        ],
        out_specs=pl.BlockSpec((tm, tn), lambda i, j: (i, j)),
        compiler_params=pltpu.CompilerParams(
            dimension_semantics=("parallel", "parallel"),
            vmem_limit_bytes=vmem_limit,
        ),
    )(x, w_t)


def prototypes_forward(x, w, *, tm=4096, tn_max=2048):
    """Convenience wrapper accepting the PyTorch-layout weight [P, D]."""
    return prototypes_forward_t(x, prepare_prototypes_weight(w), tm=tm, tn_max=tn_max)


if __name__ == "__main__":
    # Small shapes consistent with the module's forward pass.
    output_dim = 32       # feature dim of x
    num_prototypes = 16   # number of prototype vectors
    batch = 8

    key = jax.random.PRNGKey(0)
    kx, kw = jax.random.split(key)
    x = jax.random.normal(kx, (batch, output_dim), dtype=jnp.float32)
    # Deterministic init of the Linear weight (PyTorch layout: [out, in]).
    w = jax.random.normal(kw, (num_prototypes, output_dim), dtype=jnp.float32) * 0.1

    # One-time weight prep (hoisted transpose), then forward.
    w_t = prepare_prototypes_weight(w)
    out = prototypes_forward_t(x, w_t)
    jax.block_until_ready(out)

    # Reference check against plain JAX (x @ W^T).
    ref = x @ w.T
    assert out.shape == (batch, num_prototypes)
    assert jnp.allclose(out, ref, atol=1e-5, rtol=1e-5)

    # Batch size that is NOT a sublane multiple (ragged last block, no padding).
    x2 = jax.random.normal(jax.random.PRNGKey(1), (13, output_dim), dtype=jnp.float32)
    out2 = prototypes_forward_t(x2, w_t)
    jax.block_until_ready(out2)
    assert out2.shape == (13, num_prototypes)
    assert jnp.allclose(out2, x2 @ w.T, atol=1e-5, rtol=1e-5)

    # Larger batch exercising the multi-step batch grid / megacore split path.
    x3 = jax.random.normal(jax.random.PRNGKey(2), (1024, output_dim), dtype=jnp.float32)
    out3 = prototypes_forward_t(x3, w_t)
    jax.block_until_ready(out3)
    assert out3.shape == (1024, num_prototypes)
    assert jnp.allclose(out3, x3 @ w.T, atol=1e-4, rtol=1e-4)

    # TODO(synk): normalize_prototypes() (weight_norm re-parameterization) is a
    # training-time parameter update, not part of forward; not implemented here.
    print("KERNEL_OK")
</pallas_src>

<mosaic_0001>
module attributes {stable_mosaic.version = 11 : i64} {
  func.func @_prototypes_kernel(%arg0: i32, %arg1: i32, %arg2: memref<8x32xf32, #tpu.memory_space<vmem>>, %arg3: memref<32x16xf32, #tpu.memory_space<vmem>>, %arg4: memref<8x16xf32, #tpu.memory_space<vmem>>) attributes {dimension_semantics = [#tpu.dimension_semantics<parallel>, #tpu.dimension_semantics<parallel>], iteration_bounds = array<i64: 1, 1>, scalar_prefetch = 0 : i64, scratch_operands = 0 : i64, tpu.core_type = #tpu.core_type<tc>, window_params = [{transform_indices = @transform_0, window_bounds = array<i64: 8, 32>}, {transform_indices = @transform_1, window_bounds = array<i64: 32, 16>}, {transform_indices = @transform_2, window_bounds = array<i64: 8, 16>}]} {
    %c0 = arith.constant 0 : index
    %c0_0 = arith.constant 0 : index
    %0 = vector.load %arg2[%c0, %c0_0] : memref<8x32xf32, #tpu.memory_space<vmem>>, vector<8x32xf32>
    %c0_1 = arith.constant 0 : index
    %c0_2 = arith.constant 0 : index
    %1 = vector.load %arg3[%c0_1, %c0_2] : memref<32x16xf32, #tpu.memory_space<vmem>>, vector<32x16xf32>
    %cst = arith.constant dense<0.000000e+00> : vector<8x16xf32>
    %2 = tpu.matmul %0, %1, %cst {dimension_numbers = #tpu.dot_dimension_numbers<[1], [0], [0], [1], [0, 0, 1, 1], [], []>} : vector<8x32xf32>, vector<32x16xf32>, vector<8x16xf32> -> vector<8x16xf32>
    %c0_3 = arith.constant 0 : index
    %c0_4 = arith.constant 0 : index
    %3 = vector.load %arg4[%c0_3, %c0_4] : memref<8x16xf32, #tpu.memory_space<vmem>>, vector<8x16xf32>
    tpu.vector_store %arg4[%c0_3, %c0_4], %2 {strides = array<i32>} : memref<8x16xf32, #tpu.memory_space<vmem>>, vector<8x16xf32>,
    return
  }
  func.func @transform_0(%arg0: i32, %arg1: i32) -> (i32, i32) {
    %c0_i32 = arith.constant 0 : i32
    %c0_i32_0 = arith.constant 0 : i32
    return %arg0, %c0_i32 : i32, i32
  }
  func.func @transform_1(%arg0: i32, %arg1: i32) -> (i32, i32) {
    %c0_i32 = arith.constant 0 : i32
    %c0_i32_0 = arith.constant 0 : i32
    return %c0_i32, %arg1 : i32, i32
  }
  func.func @transform_2(%arg0: i32, %arg1: i32) -> (i32, i32) {
    %c0_i32 = arith.constant 0 : i32
    return %arg0, %arg1 : i32, i32
  }
}

</mosaic_0001>

<bundles_post_ra>
// kernel: tpu_custom_call.1
= control target key start
LH: loop header
LB: loop body
LE: loop exit
PB: predicated region body
PF: predicated region fallthrough
CT: control target
= control target key end

     0   :  { %v158_v3 = vmov 0.0|0.0   ;;  %vm159_vm0 = vmmov 0   ;;  %v160_v6 = vmov 0.0   ;;  %s204_s0 = inlined_call_operand.vmem [shape: f32[8,32], index: 0, kind: input, shape index: {}]   ;;  %s205_s1 = inlined_call_operand.vmem [shape: f32[32,16], index: 1, kind: input, shape index: {}]   ;;  %s206_s2 = inlined_call_operand.hbm [shape: f32[8,16], index: 2, kind: output, shape index: {}]  }
   0x1   :  { %v13_v0 = vld [vmem:[%s205_s1] sm:$0xff]  ;;  %v14_v1 = vld [vmem:[%s205_s1 + $0x8] sm:$0xff]  ;;  %v15_v2 = vld [vmem:[%s205_s1 + $0x10] sm:$0xff]  ;;  %124 = vmatprep.subr.bf16.mxu0 %v158_v3  ;;  %121 = vmatprep.mubr.msk.f32.mxu0 %vm159_vm0, %v160_v6 }
   0x2   :  { %v125_v4 = vpack.c.bf16 %v14_v1, %v13_v0  ;;  %v16_v5 = vld [vmem:[%s205_s1 + $0x18] sm:$0xff] }
   0x3   :  { %7 = vsyncpa [#allocation3], 0  ;;  %v128_v7 = vpack.c.bf16 %v16_v5, %v15_v2  ;;  %v12_v8 = vld [vmem:[%s204_s0] sm:$0xff]  ;;  %vm17_vm1 = vcmask 261120   ;;  %s161_s19 = smov [#allocation2]   ;;  %vm91_vm2 = vcmask 130048  }
   0x4   :  { %126 = vmatpush3.bf16.msra.mxu0 %v125_v4  ;;  %s99_s20 = sshll.u32 %s161_s19, 4  ;;  %s100_s20 = int_to_ptr.vmem [resolvable:$true] %s99_s20 }
   0x5   :  { %127 = vmatprep.subr.bf16.mxu0 %v158_v3  ;;  %s134_s1 = scalar_lea.vmem %s100_s20, 128  ;;  %p139_p1 = scmp.lt.s32.totalorder %s100_s20, %s100_s20 }
   0x6   :  { %p135_p0 = scmp.ne.s32.totalorder %s100_s20, %s134_s1  ;;  %p140_p2 = scmp.lt.s32.totalorder %s134_s1, %s134_s1 }
   0x8   :  { %129 = vmatpush3.bf16.msra.mxu0 %v128_v7  ;;  %p141_p3 = por %p140_p2, %p139_p1 }
   0xa   :  { %p142_p4 = pnand %p141_p3, %p135_p0 }
   0xb   :  { %122 = vmatmul.mubr.msk.f32.vlgmr.msra.gmra.mrb[0].mxu0 %vm17_vm1, %v12_v8 }
  0xde   :  { %v87_v9 = vpop.f32.mrb[0].mxu0 }
  0xdf   :  { %92 = vst.msk [vmem:[#allocation2] sm:$0xff] %vm91_vm2, %v87_v9  ;;  %v123_v10 = vpop.f32.mrb[1].mxu0 }
  0xe0   :  { %145 = shalt.err (!%p142_p4)
}
  0xe1   :  { %s146_s0 = scalar_lea.hbm %s206_s2, 128 }
  0xe2   :  { %p147_p5 = scmp.ne.s32.totalorder %s206_s2, %s146_s0  ;;  %p150_p6 = scmp.lt.u32.totalorder %s146_s0, %s206_s2 }
  0xe4   :  { %p152_p7 = pnand %p150_p6, %p147_p5 }
  0xe6   :  { %155 = shalt.err (!%p152_p7)
}
  0xe7   :  { %102 = dma.vmem_to_hbm [thread:$0]  %s100_s20, 128, %s206_s2, [#allocation3]  }
  0xe8   :  { %156 = dma.done.wait [#allocation3], 128  }
  0xe9   :  { %157 = vsyncadd [#allocation3], 4294967168 }
  0xea   :  { %106 = vsyncpa [#allocation3], 1 }

</bundles_post_ra>
